<compile_context>
chip_gen: v6e
topology: v6e:2x2x1
jax: 0.10.0
libtpu: 0.0.40
codegen_flags: <defaults>
</compile_context>

<pallas_src>
import jax
import jax.numpy as jnp
from jax import lax
from jax.experimental import pallas as pl
from jax.experimental.pallas import tpu as pltpu

_NCE_TEMPERATURE = 0.07
_NORM_EPS = 1e-12  # matches torch.nn.functional.normalize default eps


# ----------------------------------------------------------------------------
# Kernel
# ----------------------------------------------------------------------------
def _cross_video_kernel(packed_ref, out_ref):
    """Fused CrossVideoLoss forward: both NCE terms, one kernel body.

    packed_ref: (4, N, T, D) f32, order [HA, EA, HB, EB].
    out_ref:    (1, 128) f32 lane-dense slab; loss broadcast, caller reads [0,0].
    """
    x = packed_ref[...].astype(jnp.float32)          # (4, N, T, D)
    ha, ea, hb, eb = x[0], x[1], x[2], x[3]

    inv_t = jnp.float32(1.0 / _NCE_TEMPERATURE)      # compile-time constant
    eps_sq = jnp.float32(_NORM_EPS * _NORM_EPS)

    def inv_norm(v, axis):
        # 1 / max(||v||, eps) == rsqrt(max(||v||^2, eps^2))  -> EUP slot.
        ss = jnp.sum(v * v, axis=axis, keepdims=True)
        return lax.rsqrt(jnp.maximum(ss, eps_sq))

    def nce(h, e_same, neg):
        # q = normalize(mean_T h), k = normalize(mean_T e_same); instead of
        # normalizing the tensors (and the whole (N,T,D) neg bank) we fold the
        # normalization and the 1/T scale into scalar factors on the raw dots
        # (exactly equivalent: q.(v/m) == (q.v)/m with m = max(||v||, eps)).
        q = jnp.mean(h, axis=1)                       # (N, D)
        k = jnp.mean(e_same, axis=1)                  # (N, D)
        q_scale = inv_norm(q, axis=1) * inv_t         # (N, 1)
        k_scale = inv_norm(k, axis=1)                 # (N, 1)
        neg_scale = inv_norm(neg, axis=2)[..., 0]     # (N, T)

        # l_pos = einsum('nc,nc->n')/T  -> (N, 1)
        l_pos = jnp.sum(q * k, axis=1, keepdims=True) * q_scale * k_scale
        # l_neg = einsum('nc,nck->nk')/T -> (N, T).  At D=32 this contraction
        # is a single-vreg bcast-mul + lane reduce (VPU/XLU).
        # TODO(synk): switch to lax.dot_general on the MXU once D >= 128.
        l_neg = jnp.sum(q[:, None, :] * neg, axis=2) * q_scale * neg_scale

        # CrossEntropyLoss against class 0 (the l_pos logit):
        #   mean_n( logsumexp([l_pos_n, l_neg_n]) - l_pos_n )
        m = jnp.maximum(l_pos, jnp.max(l_neg, axis=1, keepdims=True))
        sum_exp = (jnp.exp(l_pos - m)
                   + jnp.sum(jnp.exp(l_neg - m), axis=1, keepdims=True))
        lse = jnp.log(sum_exp) + m
        return jnp.mean(lse - l_pos)

    loss = nce(ha, ea, eb) + nce(hb, eb, ea)

    # Lane-dense output slab: unmasked vector store; caller reads [0, 0].
    out_ref[...] = jnp.full((1, 128), loss, dtype=jnp.float32)


# ----------------------------------------------------------------------------
# Wrappers
# ----------------------------------------------------------------------------
@jax.jit
def cross_video_loss_packed(packed):
    """Fast path: packed (4, N, T, D) buffer, order [HA, EA, HB, EB]."""
    _, n, t, d = packed.shape
    in_bytes = packed.size * packed.dtype.itemsize
    # Rough advisory cost model: means + norms + dots + logsumexp.
    flops = 14 * 4 * n * t * d
    transcendentals = 4 * n + 2 * n * t + 4 * n        # rsqrt + exp + log
    out = pl.pallas_call(
        _cross_video_kernel,
        out_shape=jax.ShapeDtypeStruct((1, 128), jnp.float32),
        in_specs=[pl.BlockSpec(memory_space=pltpu.MemorySpace.VMEM)],
        out_specs=pl.BlockSpec(memory_space=pltpu.MemorySpace.VMEM),
        cost_estimate=pl.CostEstimate(
            flops=flops,
            transcendentals=transcendentals,
            bytes_accessed=in_bytes + 128 * 4,
        ),
    )(packed)
    return out[0, 0]


def cross_video_loss(contrast_pairs):
    """API-compatible wrapper taking the {'HA','EA','HB','EB'} dict.

    NOTE: the stack below costs an extra HBM round trip; producers that can
    emit the packed (4, N, T, D) buffer directly should call
    cross_video_loss_packed instead (single DMA into the kernel).
    """
    packed = jnp.stack([contrast_pairs['HA'], contrast_pairs['EA'],
                        contrast_pairs['HB'], contrast_pairs['EB']], axis=0)
    return cross_video_loss_packed(packed)


# ----------------------------------------------------------------------------
# Pure-JAX reference (mirrors the PyTorch module) for a sanity check.
# ----------------------------------------------------------------------------
def _cross_video_loss_ref(contrast_pairs):
    def normalize(x, axis):
        n = jnp.sqrt(jnp.sum(x * x, axis=axis, keepdims=True))
        return x / jnp.maximum(n, _NORM_EPS)

    def nce(q, k, neg):
        q = normalize(q, 1)
        k = normalize(k, 1)
        neg = normalize(neg, 2)                       # == permute + normalize(dim=1)
        l_pos = jnp.sum(q * k, axis=1, keepdims=True)
        l_neg = jnp.sum(q[:, None, :] * neg, axis=2)
        logits = jnp.concatenate([l_pos, l_neg], axis=1) / _NCE_TEMPERATURE
        lse = jax.nn.logsumexp(logits, axis=1)
        return jnp.mean(lse - logits[:, 0])

    a = nce(jnp.mean(contrast_pairs['HA'], 1), jnp.mean(contrast_pairs['EA'], 1),
            contrast_pairs['EB'])
    b = nce(jnp.mean(contrast_pairs['HB'], 1), jnp.mean(contrast_pairs['EB'], 1),
            contrast_pairs['EA'])
    return a + b


# ----------------------------------------------------------------------------
# Main
# ----------------------------------------------------------------------------
if __name__ == "__main__":
    N, T, D = 4, 8, 32   # (videos, segments, feature dim)

    key = jax.random.PRNGKey(0)
    # The "producer" emits one contiguous packed buffer: [HA, EA, HB, EB].
    packed = jax.random.normal(key, (4, N, T, D), jnp.float32)
    contrast_pairs = {
        'HA': packed[0], 'EA': packed[1], 'HB': packed[2], 'EB': packed[3],
    }

    loss = cross_video_loss_packed(packed)
    jax.block_until_ready(loss)

    ref = _cross_video_loss_ref(contrast_pairs)
    assert jnp.allclose(loss, ref, rtol=1e-5, atol=1e-5), (float(loss), float(ref))

    # Dict API path (stacks, then calls the same fused kernel).
    loss_dict = cross_video_loss(contrast_pairs)
    jax.block_until_ready(loss_dict)
    assert jnp.allclose(loss_dict, ref, rtol=1e-5, atol=1e-5), (
        float(loss_dict), float(ref))

    print("KERNEL_OK")
</pallas_src>

<mosaic_0001>
module attributes {stable_mosaic.version = 11 : i64} {
  func.func @_cross_video_kernel(%arg0: memref<4x4x8x32xf32, #tpu.memory_space<vmem>>, %arg1: memref<1x128xf32, #tpu.memory_space<vmem>>) attributes {dimension_semantics = [], scalar_prefetch = 0 : i64, scratch_operands = 0 : i64, tpu.core_type = #tpu.core_type<tc>} {
    %c0 = arith.constant 0 : index
    %c0_0 = arith.constant 0 : index
    %c0_1 = arith.constant 0 : index
    %c0_2 = arith.constant 0 : index
    %0 = vector.load %arg0[%c0, %c0_0, %c0_1, %c0_2] : memref<4x4x8x32xf32, #tpu.memory_space<vmem>>, vector<4x4x8x32xf32>
    %1 = vector.extract_strided_slice %0 {offsets = [0, 0, 0, 0], sizes = [1, 4, 8, 32], strides = [1, 1, 1, 1]} : vector<4x4x8x32xf32> to vector<1x4x8x32xf32>
    %2 = vector.shape_cast %1 : vector<1x4x8x32xf32> to vector<4x8x32xf32>
    %3 = vector.extract_strided_slice %0 {offsets = [1, 0, 0, 0], sizes = [1, 4, 8, 32], strides = [1, 1, 1, 1]} : vector<4x4x8x32xf32> to vector<1x4x8x32xf32>
    %4 = vector.shape_cast %3 : vector<1x4x8x32xf32> to vector<4x8x32xf32>
    %5 = vector.extract_strided_slice %0 {offsets = [2, 0, 0, 0], sizes = [1, 4, 8, 32], strides = [1, 1, 1, 1]} : vector<4x4x8x32xf32> to vector<1x4x8x32xf32>
    %6 = vector.shape_cast %5 : vector<1x4x8x32xf32> to vector<4x8x32xf32>
    %7 = vector.extract_strided_slice %0 {offsets = [3, 0, 0, 0], sizes = [1, 4, 8, 32], strides = [1, 1, 1, 1]} : vector<4x4x8x32xf32> to vector<1x4x8x32xf32>
    %8 = vector.shape_cast %7 : vector<1x4x8x32xf32> to vector<4x8x32xf32>
    %cst = arith.constant dense<0.000000e+00> : vector<4x32xf32>
    %9 = vector.multi_reduction <add>, %2, %cst [1] : vector<4x8x32xf32> to vector<4x32xf32>
    %cst_3 = arith.constant 8.000000e+00 : f32
    %10 = vector.broadcast %cst_3 : f32 to vector<4x32xf32>
    %11 = arith.divf %9, %10 : vector<4x32xf32>
    %cst_4 = arith.constant dense<0.000000e+00> : vector<4x32xf32>
    %12 = vector.multi_reduction <add>, %4, %cst_4 [1] : vector<4x8x32xf32> to vector<4x32xf32>
    %cst_5 = arith.constant 8.000000e+00 : f32
    %13 = vector.broadcast %cst_5 : f32 to vector<4x32xf32>
    %14 = arith.divf %12, %13 : vector<4x32xf32>
    %15 = arith.mulf %11, %11 : vector<4x32xf32>
    %cst_6 = arith.constant dense<0.000000e+00> : vector<4xf32>
    %16 = vector.multi_reduction <add>, %15, %cst_6 [1] : vector<4x32xf32> to vector<4xf32>
    %17 = vector.shape_cast %16 : vector<4xf32> to vector<4x1xf32>
    %cst_7 = arith.constant 1.000000e-24 : f32
    %18 = vector.broadcast %cst_7 : f32 to vector<4x1xf32>
    %19 = arith.maximumf %17, %18 : vector<4x1xf32>
    %20 = math.rsqrt %19 : vector<4x1xf32>
    %cst_8 = arith.constant 14.2857141 : f32
    %21 = vector.broadcast %cst_8 : f32 to vector<4x1xf32>
    %22 = arith.mulf %20, %21 : vector<4x1xf32>
    %23 = arith.mulf %14, %14 : vector<4x32xf32>
    %cst_9 = arith.constant dense<0.000000e+00> : vector<4xf32>
    %24 = vector.multi_reduction <add>, %23, %cst_9 [1] : vector<4x32xf32> to vector<4xf32>
    %25 = vector.shape_cast %24 : vector<4xf32> to vector<4x1xf32>
    %cst_10 = arith.constant 1.000000e-24 : f32
    %26 = vector.broadcast %cst_10 : f32 to vector<4x1xf32>
    %27 = arith.maximumf %25, %26 : vector<4x1xf32>
    %28 = math.rsqrt %27 : vector<4x1xf32>
    %29 = arith.mulf %8, %8 : vector<4x8x32xf32>
    %cst_11 = arith.constant dense<0.000000e+00> : vector<4x8xf32>
    %30 = vector.multi_reduction <add>, %29, %cst_11 [2] : vector<4x8x32xf32> to vector<4x8xf32>
    %31 = vector.shape_cast %30 : vector<4x8xf32> to vector<4x8x1xf32>
    %cst_12 = arith.constant 1.000000e-24 : f32
    %32 = vector.broadcast %cst_12 : f32 to vector<4x8x1xf32>
    %33 = arith.maximumf %31, %32 : vector<4x8x1xf32>
    %34 = math.rsqrt %33 : vector<4x8x1xf32>
    %35 = vector.shape_cast %34 : vector<4x8x1xf32> to vector<4x8xf32>
    %36 = arith.mulf %11, %14 : vector<4x32xf32>
    %cst_13 = arith.constant dense<0.000000e+00> : vector<4xf32>
    %37 = vector.multi_reduction <add>, %36, %cst_13 [1] : vector<4x32xf32> to vector<4xf32>
    %38 = vector.shape_cast %37 : vector<4xf32> to vector<4x1xf32>
    %39 = arith.mulf %38, %22 : vector<4x1xf32>
    %40 = arith.mulf %39, %28 : vector<4x1xf32>
    %41 = vector.shape_cast %11 : vector<4x32xf32> to vector<4x1x32xf32>
    %42 = vector.broadcast %41 : vector<4x1x32xf32> to vector<4x8x32xf32>
    %43 = arith.mulf %42, %8 : vector<4x8x32xf32>
    %cst_14 = arith.constant dense<0.000000e+00> : vector<4x8xf32>
    %44 = vector.multi_reduction <add>, %43, %cst_14 [2] : vector<4x8x32xf32> to vector<4x8xf32>
    %45 = vector.broadcast %22 : vector<4x1xf32> to vector<4x8xf32>
    %46 = arith.mulf %44, %45 : vector<4x8xf32>
    %47 = arith.mulf %46, %35 : vector<4x8xf32>
    %cst_15 = arith.constant dense<0xFF800000> : vector<4xf32>
    %48 = vector.multi_reduction <maximumf>, %47, %cst_15 [1] : vector<4x8xf32> to vector<4xf32>
    %49 = vector.shape_cast %48 : vector<4xf32> to vector<4x1xf32>
    %50 = arith.maximumf %40, %49 : vector<4x1xf32>
    %51 = arith.subf %40, %50 : vector<4x1xf32>
    %52 = math.exp %51 : vector<4x1xf32>
    %53 = vector.broadcast %50 : vector<4x1xf32> to vector<4x8xf32>
    %54 = arith.subf %47, %53 : vector<4x8xf32>
    %55 = math.exp %54 : vector<4x8xf32>
    %cst_16 = arith.constant dense<0.000000e+00> : vector<4xf32>
    %56 = vector.multi_reduction <add>, %55, %cst_16 [1] : vector<4x8xf32> to vector<4xf32>
    %57 = vector.shape_cast %56 : vector<4xf32> to vector<4x1xf32>
    %58 = arith.addf %52, %57 : vector<4x1xf32>
    %59 = math.log %58 : vector<4x1xf32>
    %60 = arith.addf %59, %50 : vector<4x1xf32>
    %61 = arith.subf %60, %40 : vector<4x1xf32>
    %62 = vector.shape_cast %61 : vector<4x1xf32> to vector<1x4x1xf32>
    %cst_17 = arith.constant dense<0.000000e+00> : vector<1xf32>
    %63 = vector.multi_reduction <add>, %62, %cst_17 [1, 2] : vector<1x4x1xf32> to vector<1xf32>
    %64 = vector.shape_cast %63 : vector<1xf32> to vector<1x1x1xf32>
    %65 = vector.extract %64[0, 0, 0] : f32 from vector<1x1x1xf32>
    %cst_18 = arith.constant 4.000000e+00 : f32
    %66 = arith.divf %65, %cst_18 : f32
    %cst_19 = arith.constant dense<0.000000e+00> : vector<4x32xf32>
    %67 = vector.multi_reduction <add>, %6, %cst_19 [1] : vector<4x8x32xf32> to vector<4x32xf32>
    %cst_20 = arith.constant 8.000000e+00 : f32
    %68 = vector.broadcast %cst_20 : f32 to vector<4x32xf32>
    %69 = arith.divf %67, %68 : vector<4x32xf32>
    %cst_21 = arith.constant dense<0.000000e+00> : vector<4x32xf32>
    %70 = vector.multi_reduction <add>, %8, %cst_21 [1] : vector<4x8x32xf32> to vector<4x32xf32>
    %cst_22 = arith.constant 8.000000e+00 : f32
    %71 = vector.broadcast %cst_22 : f32 to vector<4x32xf32>
    %72 = arith.divf %70, %71 : vector<4x32xf32>
    %73 = arith.mulf %69, %69 : vector<4x32xf32>
    %cst_23 = arith.constant dense<0.000000e+00> : vector<4xf32>
    %74 = vector.multi_reduction <add>, %73, %cst_23 [1] : vector<4x32xf32> to vector<4xf32>
    %75 = vector.shape_cast %74 : vector<4xf32> to vector<4x1xf32>
    %cst_24 = arith.constant 1.000000e-24 : f32
    %76 = vector.broadcast %cst_24 : f32 to vector<4x1xf32>
    %77 = arith.maximumf %75, %76 : vector<4x1xf32>
    %78 = math.rsqrt %77 : vector<4x1xf32>
    %cst_25 = arith.constant 14.2857141 : f32
    %79 = vector.broadcast %cst_25 : f32 to vector<4x1xf32>
    %80 = arith.mulf %78, %79 : vector<4x1xf32>
    %81 = arith.mulf %72, %72 : vector<4x32xf32>
    %cst_26 = arith.constant dense<0.000000e+00> : vector<4xf32>
    %82 = vector.multi_reduction <add>, %81, %cst_26 [1] : vector<4x32xf32> to vector<4xf32>
    %83 = vector.shape_cast %82 : vector<4xf32> to vector<4x1xf32>
    %cst_27 = arith.constant 1.000000e-24 : f32
    %84 = vector.broadcast %cst_27 : f32 to vector<4x1xf32>
    %85 = arith.maximumf %83, %84 : vector<4x1xf32>
    %86 = math.rsqrt %85 : vector<4x1xf32>
    %87 = arith.mulf %4, %4 : vector<4x8x32xf32>
    %cst_28 = arith.constant dense<0.000000e+00> : vector<4x8xf32>
    %88 = vector.multi_reduction <add>, %87, %cst_28 [2] : vector<4x8x32xf32> to vector<4x8xf32>
    %89 = vector.shape_cast %88 : vector<4x8xf32> to vector<4x8x1xf32>
    %cst_29 = arith.constant 1.000000e-24 : f32
    %90 = vector.broadcast %cst_29 : f32 to vector<4x8x1xf32>
    %91 = arith.maximumf %89, %90 : vector<4x8x1xf32>
    %92 = math.rsqrt %91 : vector<4x8x1xf32>
    %93 = vector.shape_cast %92 : vector<4x8x1xf32> to vector<4x8xf32>
    %94 = arith.mulf %69, %72 : vector<4x32xf32>
    %cst_30 = arith.constant dense<0.000000e+00> : vector<4xf32>
    %95 = vector.multi_reduction <add>, %94, %cst_30 [1] : vector<4x32xf32> to vector<4xf32>
    %96 = vector.shape_cast %95 : vector<4xf32> to vector<4x1xf32>
    %97 = arith.mulf %96, %80 : vector<4x1xf32>
    %98 = arith.mulf %97, %86 : vector<4x1xf32>
    %99 = vector.shape_cast %69 : vector<4x32xf32> to vector<4x1x32xf32>
    %100 = vector.broadcast %99 : vector<4x1x32xf32> to vector<4x8x32xf32>
    %101 = arith.mulf %100, %4 : vector<4x8x32xf32>
    %cst_31 = arith.constant dense<0.000000e+00> : vector<4x8xf32>
    %102 = vector.multi_reduction <add>, %101, %cst_31 [2] : vector<4x8x32xf32> to vector<4x8xf32>
    %103 = vector.broadcast %80 : vector<4x1xf32> to vector<4x8xf32>
    %104 = arith.mulf %102, %103 : vector<4x8xf32>
    %105 = arith.mulf %104, %93 : vector<4x8xf32>
    %cst_32 = arith.constant dense<0xFF800000> : vector<4xf32>
    %106 = vector.multi_reduction <maximumf>, %105, %cst_32 [1] : vector<4x8xf32> to vector<4xf32>
    %107 = vector.shape_cast %106 : vector<4xf32> to vector<4x1xf32>
    %108 = arith.maximumf %98, %107 : vector<4x1xf32>
    %109 = arith.subf %98, %108 : vector<4x1xf32>
    %110 = math.exp %109 : vector<4x1xf32>
    %111 = vector.broadcast %108 : vector<4x1xf32> to vector<4x8xf32>
    %112 = arith.subf %105, %111 : vector<4x8xf32>
    %113 = math.exp %112 : vector<4x8xf32>
    %cst_33 = arith.constant dense<0.000000e+00> : vector<4xf32>
    %114 = vector.multi_reduction <add>, %113, %cst_33 [1] : vector<4x8xf32> to vector<4xf32>
    %115 = vector.shape_cast %114 : vector<4xf32> to vector<4x1xf32>
    %116 = arith.addf %110, %115 : vector<4x1xf32>
    %117 = math.log %116 : vector<4x1xf32>
    %118 = arith.addf %117, %108 : vector<4x1xf32>
    %119 = arith.subf %118, %98 : vector<4x1xf32>
    %120 = vector.shape_cast %119 : vector<4x1xf32> to vector<1x4x1xf32>
    %cst_34 = arith.constant dense<0.000000e+00> : vector<1xf32>
    %121 = vector.multi_reduction <add>, %120, %cst_34 [1, 2] : vector<1x4x1xf32> to vector<1xf32>
    %122 = vector.shape_cast %121 : vector<1xf32> to vector<1x1x1xf32>
    %123 = vector.extract %122[0, 0, 0] : f32 from vector<1x1x1xf32>
    %cst_35 = arith.constant 4.000000e+00 : f32
    %124 = arith.divf %123, %cst_35 : f32
    %125 = arith.addf %66, %124 : f32
    %126 = vector.broadcast %125 : f32 to vector<1x128xf32>
    %c0_36 = arith.constant 0 : index
    %c0_37 = arith.constant 0 : index
    %127 = vector.load %arg1[%c0_36, %c0_37] : memref<1x128xf32, #tpu.memory_space<vmem>>, vector<1x128xf32>
    tpu.vector_store %arg1[%c0_36, %c0_37], %126 {strides = array<i32>} : memref<1x128xf32, #tpu.memory_space<vmem>>, vector<1x128xf32>,
    return
  }
}

</mosaic_0001>

<bundles_post_ra>
// kernel: cross_video_loss_packed.1
= control target key start
LH: loop header
LB: loop body
LE: loop exit
PB: predicated region body
PF: predicated region fallthrough
CT: control target
= control target key end

     0   :  { %6 = vsyncpa [#allocation3], 0  ;;  %s1138_s0 = inlined_call_operand.hbm [shape: f32[4,4,8,32], index: 0, kind: input, shape index: {}]   ;;  %s1139_s1 = inlined_call_operand.hbm [shape: f32[1,128], index: 1, kind: output, shape index: {}]  }
   0x1   :  { %7 = vsyncpa [#allocation4], 0  ;;  %s806_s6 = smov [#allocation2]  }
   0x2   :  { %s13_s7 = sshll.u32 %s806_s6, 4  ;;  %s14_s7 = int_to_ptr.vmem [resolvable:$true] %s13_s7 }
   0x3   :  { %s770_s8 = scalar_lea.vmem %s14_s7, 2048  ;;  %p775_p1 = scmp.lt.s32.totalorder %s14_s7, %s14_s7 }
   0x4   :  { %p771_p0 = scmp.ne.s32.totalorder %s14_s7, %s770_s8  ;;  %p776_p2 = scmp.lt.s32.totalorder %s770_s8, %s770_s8 }
   0x6   :  { %p777_p3 = por %p776_p2, %p775_p1 }
   0x8   :  { %p778_p4 = pnand %p777_p3, %p771_p0 }
   0xa   :  { %781 = shalt.err (!%p778_p4)
}
   0xb   :  { %s807_s9 = smov 128   ;;  %s808_s10 = smov 8  }
   0xc   :  { %19 = dma.hbm_to_vmem [thread:$0]  %s1138_s0, 2048, %s14_s7, [#allocation3], %s807_s9, %s807_s9, %s808_s10  }
   0xd   :  { %802 = dma.done.wait [#allocation3], 2048  }
   0xe   :  { %803 = vsyncadd [#allocation3], 4294965248  ;;  %v824_v0 = vld [vmem:[#allocation2 + $0x60] sm:$0xff]  ;;  %vm39_vm0 = vcmask 261120   ;;  %v826_v1 = vld [vmem:[#allocation2 + $0x68] sm:$0xff]  ;;  %vm113_vm1 = vcmask 1041409  }
   0xf   :  { %v828_v2 = vld [vmem:[#allocation2 + $0x20] sm:$0xff]  ;;  %v144_v3 = vmul.f32 %v824_v0, %v824_v0  ;;  %v834_v4 = vsel %vm39_vm0, %v824_v0, 0.0  ;;  %v145_v5 = vmul.f32 %v826_v1, %v826_v1  ;;  %v840_v6 = vsel %vm39_vm0, %v826_v1, 0.0  ;;  %v848_v9 = vld [vmem:[#allocation2 + $0x28] sm:$0xff]  ;;  %v25_v15 = vld [vmem:[#allocation2 + $0x10] sm:$0xff]  ;;  %s810_s16 = smov [#allocation5]  }
  0x10   :  { %v466_v7 = vmul.f32 %v828_v2, %v828_v2  ;;  %v846_v8 = vsel %vm39_vm0, %v828_v2, 0.0  ;;  %v23_v10 = vld [vmem:[#allocation2] sm:$0xff]  ;;  %v24_v12 = vld [vmem:[#allocation2 + $0x8] sm:$0xff]  ;;  %v854_v14 = vsel %vm39_vm0, %v848_v9, 0.0  ;;  %v467_v17 = vmul.f32 %v848_v9, %v848_v9  ;;  %v26_v19 = vld [vmem:[#allocation2 + $0x18] sm:$0xff]  ;;  %s694_s17 = sshll.u32 %s810_s16, 4  ;;  %s695_s17 = int_to_ptr.vmem [resolvable:$true] %s694_s17 }
  0x11   :  { %v148_v11 = vsel %vm39_vm0, %v144_v3, 0.0  ;;  %v151_v16 = vsel %vm39_vm0, %v145_v5, 0.0  ;;  %v40_v18 = vsel %vm39_vm0, %v23_v10, 0.0  ;;  %v47_v21 = vsel %vm39_vm0, %v24_v12, 0.0  ;;  %v864_v37 = vld [vmem:[#allocation2 + $0x30] sm:$0xff]  ;;  %v31_v41 = vld [vmem:[#allocation2 + $0x40] sm:$0xff]  ;;  %p787_p6 = scmp.lt.s32.totalorder %s695_s17, %s695_s17 }
  0x12   :  { %149 = vadd.xlane.f32.xlu1 %v148_v11  ;;  %v470_v13 = vsel %vm39_vm0, %v466_v7, 0.0  ;;  %v41_v20 = vrot.slane %v40_v18, 4  ;;  %v48_v22 = vrot.slane %v47_v21, 4  ;;  %v54_v23 = vsel %vm39_vm0, %v25_v15, 0.0  ;;  %v32_v42 = vld [vmem:[#allocation2 + $0x48] sm:$0xff]  ;;  %v33_v50 = vld [vmem:[#allocation2 + $0x50] sm:$0xff] }
  0x13   :  { %471 = vadd.xlane.f32.xlu0 %v470_v13  ;;  %v55_v25 = vrot.slane %v54_v23, 4  ;;  %v473_v26 = vsel %vm39_vm0, %v467_v17, 0.0  ;;  %v61_v28 = vsel %vm39_vm0, %v26_v19, 0.0  ;;  %v868_v40 = vsel %vm39_vm0, %v864_v37, 0.0  ;;  %v34_v58 = vld [vmem:[#allocation2 + $0x58] sm:$0xff]  ;;  %s782_s19 = scalar_lea.vmem %s695_s17, 16 }
  0x14   :  { %v42_v24 = vadd.f32 %v41_v20, %v40_v18  ;;  %v49_v27 = vadd.f32 %v48_v22, %v47_v21  ;;  %v62_v32 = vrot.slane %v61_v28, 4  ;;  %v468_v47 = vmul.f32 %v864_v37, %v864_v37  ;;  %v30_v19 = vld [vmem:[#allocation2 + $0x38] sm:$0xff]  ;;  %p783_p5 = scmp.ne.s32.totalorder %s695_s17, %s782_s19  ;;  %s786_s20 = scalar_lea.vmem %s695_s17, 32 }
  0x15   :  { %v56_v30 = vadd.f32 %v55_v25, %v54_v23  ;;  %v367_v51 = vsel %vm39_vm0, %v31_v41, 0.0  ;;  %v374_v52 = vsel %vm39_vm0, %v32_v42, 0.0  ;;  %vm115_vm2 = vcmask 1042434   ;;  %v37_v41 = vld [vmem:[#allocation2 + $0x70] sm:$0xff]  ;;  %p788_p7 = scmp.lt.s32.totalorder %s786_s20, %s782_s19 }
  0x16   :  { %152 = vadd.xlane.f32.xlu1 %v151_v16  ;;  %v43_v29 = vrot.slane %v42_v24, 2  ;;  %v50_v31 = vrot.slane %v49_v27, 2  ;;  %v63_v36 = vadd.f32 %v62_v32, %v61_v28  ;;  %v476_v55 = vsel %vm39_vm0, %v468_v47, 0.0 }
  0x17   :  { %v57_v34 = vrot.slane %v56_v30, 2  ;;  %v368_v59 = vrot.slane %v367_v51, 4  ;;  %v375_v60 = vrot.slane %v374_v52, 4  ;;  %v381_v63 = vsel %vm39_vm0, %v33_v50, 0.0  ;;  %p789_p8 = por %p788_p7, %p787_p6 }
  0x18   :  { %v44_v33 = vadd.f32 %v43_v29, %v42_v24  ;;  %v51_v35 = vadd.f32 %v50_v31, %v49_v27  ;;  %v64_v44 = vrot.slane %v63_v36, 2  ;;  %vm117_vm3 = vcmask 1043459  }
  0x19   :  { %v58_v39 = vadd.f32 %v57_v34, %v56_v30  ;;  %v369_v7 = vadd.f32 %v368_v59, %v367_v51  ;;  %v376_v10 = vadd.f32 %v375_v60, %v374_v52  ;;  %v382_v12 = vrot.slane %v381_v63, 4  ;;  %p790_p9 = pnand %p789_p8, %p783_p5 }
  0x1a   :  { %474 = vadd.xlane.f32.xlu1 %v473_v26  ;;  %v45_v38 = vrot.slane %v44_v33, 1  ;;  %v52_v43 = vrot.slane %v51_v35, 1  ;;  %v65_v49 = vadd.f32 %v64_v44, %v63_v36  ;;  %v388_v13 = vsel %vm39_vm0, %v34_v58, 0.0 }
  0x1b   :  { %v59_v46 = vrot.slane %v58_v39, 1  ;;  %v370_v17 = vrot.slane %v369_v7, 2  ;;  %v377_v18 = vrot.slane %v376_v10, 2  ;;  %vm120_vm4 = vcmask 257024  }
  0x1c   :  { %v46_v45 = vadd.f32 %v45_v38, %v44_v33  ;;  %v53_v48 = vadd.f32 %v52_v43, %v51_v35  ;;  %v66_v56 = vrot.slane %v65_v49, 1  ;;  %v383_v21 = vadd.f32 %v382_v12, %v381_v63 }
  0x1d   :  { %v60_v53 = vadd.f32 %v59_v46, %v58_v39  ;;  %v389_v22 = vrot.slane %v388_v13, 4  ;;  %v371_v24 = vadd.f32 %v370_v17, %v369_v7  ;;  %v378_v25 = vadd.f32 %v377_v18, %v376_v10 }
  0x1e   :  { %v874_v54 = vmul.f32 0.125, %v46_v45  ;;  %v877_v57 = vmul.f32 0.125, %v53_v48  ;;  %477 = vadd.xlane.f32.xlu1 %v476_v55  ;;  %v67_v3 = vadd.f32 %v66_v56, %v65_v49  ;;  %v896_v26 = vsel %vm39_vm0, %v30_v19, 0.0 }
  0x1f   :  { %v879_v61 = vmul.f32 0.125, %v60_v53  ;;  %v384_v27 = vrot.slane %v383_v21, 2  ;;  %v390_v28 = vadd.f32 %v389_v22, %v388_v13  ;;  %v469_v29 = vmul.f32 %v30_v19, %v30_v19  ;;  %v38_v53 = vld [vmem:[#allocation2 + $0x78] sm:$0xff] }
  0x20   :  { %v105_v62 = vmul.f32 %v874_v54, %v874_v54  ;;  %v106_v5 = vmul.f32 %v877_v57, %v877_v57  ;;  %v889_v15 = vmul.f32 0.125, %v67_v3  ;;  %v372_v31 = vrot.slane %v371_v24, 1 }
  0x21   :  { %v107_v11 = vmul.f32 %v879_v61, %v879_v61  ;;  %v379_v32 = vrot.slane %v378_v25, 1  ;;  %v385_v34 = vadd.f32 %v384_v27, %v383_v21  ;;  %v391_v35 = vrot.slane %v390_v28, 2 }
  0x22   :  { %v114_v16 = vsel %vm113_vm1, %v106_v5, %v105_v62  ;;  %v108_v23 = vmul.f32 %v889_v15, %v889_v15  ;;  %v373_v36 = vadd.f32 %v372_v31, %v371_v24  ;;  %v479_v39 = vsel %vm39_vm0, %v469_v29, 0.0 }
  0x23   :  { %v116_v20 = vsel %vm115_vm2, %v107_v11, %v114_v16  ;;  %v380_v38 = vadd.f32 %v379_v32, %v378_v25  ;;  %v386_v42 = vrot.slane %v385_v34, 1  ;;  %v392_v43 = vadd.f32 %v391_v35, %v390_v28  ;;  %480 = vadd.xlane.f32.xlu1 %v479_v39 }
  0x24   :  { %v118_v30 = vsel %vm117_vm3, %v108_v23, %v116_v20  ;;  %v902_v44 = vsel %vm39_vm0, %v37_v41, 0.0  ;;  %v904_v45 = vmul.f32 0.125, %v373_v36  ;;  %v186_v47 = vmul.f32 %v877_v57, %v826_v1 }
  0x25   :  { %v121_v33 = vsel %vm120_vm4, %v118_v30, 0.0  ;;  %v906_v46 = vmul.f32 0.125, %v380_v38  ;;  %v387_v48 = vadd.f32 %v386_v42, %v385_v34  ;;  %v393_v49 = vrot.slane %v392_v43, 1 }
  0x26   :  { %122 = vadd.xlane.f32.xlu0 %v121_v33  ;;  %v431_v50 = vmul.f32 %v904_v45, %v904_v45  ;;  %v192_v52 = vsel %vm39_vm0, %v186_v47, 0.0  ;;  %v420_v58 = vsel %vm39_vm0, %v38_v53, 0.0  ;;  %v146_v10 = vmul.f32 %v37_v41, %v37_v41 }
  0x27   :  { %v432_v51 = vmul.f32 %v906_v46, %v906_v46  ;;  %v394_v55 = vadd.f32 %v393_v49, %v392_v43  ;;  %v915_v56 = vmul.f32 0.125, %v387_v48  ;;  %193 = vadd.xlane.f32.xlu1 %v192_v52  ;;  %v508_v1 = vmul.f32 %v906_v46, %v848_v9 }
  0x28   :  { %v147_v16 = vmul.f32 %v38_v53, %v38_v53  ;;  %v185_v20 = vmul.f32 %v874_v54, %v824_v0  ;;  %v507_v21 = vmul.f32 %v904_v45, %v828_v2  ;;  %v187_v23 = vmul.f32 %v879_v61, %v37_v41 }
  0x29   :  { %v439_v59 = vsel %vm113_vm1, %v432_v51, %v431_v50  ;;  %v921_v60 = vmul.f32 0.125, %v394_v55  ;;  %v433_v62 = vmul.f32 %v915_v56, %v915_v56  ;;  %v509_v63 = vmul.f32 %v915_v56, %v864_v37 }
  0x2a   :  { %v514_v3 = vsel %vm39_vm0, %v508_v1, 0.0  ;;  %v154_v37 = vsel %vm39_vm0, %v146_v10, 0.0  ;;  %v157_v18 = vsel %vm39_vm0, %v147_v16, 0.0  ;;  %v511_v22 = vsel %vm39_vm0, %v507_v21, 0.0 }
  0x2b   :  { %v434_v5 = vmul.f32 %v921_v60, %v921_v60  ;;  %v440_v7 = vsel %vm115_vm2, %v433_v62, %v439_v59  ;;  %515 = vadd.xlane.f32.xlu1 %v514_v3  ;;  %v517_v11 = vsel %vm39_vm0, %v509_v63, 0.0  ;;  %v510_v9 = vmul.f32 %v921_v60, %v30_v19 }
  0x2c   :  { %v189_v19 = vsel %vm39_vm0, %v185_v20, 0.0  ;;  %v195_v24 = vsel %vm39_vm0, %v187_v23, 0.0  ;;  %v188_v25 = vmul.f32 %v889_v15, %v38_v53  ;;  %v202_v0 = vlaneseq }
  0x2d   :  { %v441_v12 = vsel %vm117_vm3, %v434_v5, %v440_v7  ;;  %v520_v17 = vsel %vm39_vm0, %v510_v9, 0.0  ;;  %v400_v28 = vrot.slane %v834_v4, 4  ;;  %v74_v31 = vrot.slane %v846_v8, 4 }
  0x2e   :  { %v443_v13 = vsel %vm120_vm4, %v441_v12, 0.0  ;;  %v198_v27 = vsel %vm39_vm0, %v188_v25, 0.0  ;;  %v949_v29 = vshrl.u32 %v202_v0, 7  ;;  %v247_v2 = vand.u32 127, %v202_v0 }
  0x2f   :  { %444 = vadd.xlane.f32.xlu0 %v443_v13  ;;  %518 = vadd.xlane.f32.xlu1 %v517_v11  ;;  %v809_v32 = vmov 0   ;;  %v401_v33 = vadd.f32 %v400_v28, %v834_v4  ;;  %v407_v34 = vrot.slane %v840_v6, 4  ;;  %v75_v35 = vadd.f32 %v74_v31, %v846_v8 }
  0x30   :  { %v952_v30 = vsub.s32 %v247_v2, %v949_v29  ;;  %713 = vset.pattern.permute.xlu1 %v809_v32  ;;  %712 = vset.pattern.permute.xlu0 %v809_v32  ;;  %v81_v36 = vrot.slane %v854_v14, 4  ;;  %v414_v38 = vrot.slane %v902_v44, 4  ;;  %v421_v42 = vrot.slane %v420_v58, 4 }
  0x31   :  { %v402_v39 = vrot.slane %v401_v33, 2  ;;  %v408_v41 = vadd.f32 %v407_v34, %v840_v6  ;;  %v76_v43 = vrot.slane %v75_v35, 2  ;;  %v88_v48 = vrot.slane %v868_v40, 4 }
  0x32   :  { %v82_v47 = vadd.f32 %v81_v36, %v854_v14  ;;  %v415_v49 = vadd.f32 %v414_v38, %v902_v44  ;;  %v95_v51 = vrot.slane %v896_v26, 4  ;;  %v422_v8 = vadd.f32 %v421_v42, %v420_v58 }
  0x33   :  { %155 = vadd.xlane.f32.xlu0 %v154_v37  ;;  %521 = vadd.xlane.f32.xlu1 %v520_v17  ;;  %v403_v4 = vadd.f32 %v402_v39, %v401_v33  ;;  %v409_v50 = vrot.slane %v408_v41, 2  ;;  %v77_v52 = vadd.f32 %v76_v43, %v75_v35  ;;  %v89_v55 = vadd.f32 %v88_v48, %v868_v40 }
  0x34   :  { %v83_v53 = vrot.slane %v82_v47, 2  ;;  %v416_v59 = vrot.slane %v415_v49, 2  ;;  %v96_v62 = vadd.f32 %v95_v51, %v896_v26  ;;  %v423_v63 = vrot.slane %v422_v8, 2 }
  0x35   :  { %v404_v1 = vrot.slane %v403_v4, 1  ;;  %v410_v6 = vadd.f32 %v409_v50, %v408_v41  ;;  %v78_v14 = vrot.slane %v77_v52, 1  ;;  %v90_v5 = vrot.slane %v89_v55, 2 }
  0x36   :  { %v84_v3 = vadd.f32 %v83_v53, %v82_v47  ;;  %v417_v7 = vadd.f32 %v416_v59, %v415_v49  ;;  %v97_v11 = vrot.slane %v96_v62, 2  ;;  %v424_v9 = vadd.f32 %v423_v63, %v422_v8 }
  0x37   :  { %158 = vadd.xlane.f32.xlu0 %v157_v18  ;;  %v405_v44 = vadd.f32 %v404_v1, %v403_v4  ;;  %v411_v10 = vrot.slane %v410_v6, 1  ;;  %v79_v12 = vadd.f32 %v78_v14, %v77_v52  ;;  %v91_v13 = vadd.f32 %v90_v5, %v89_v55 }
  0x38   :  { %v85_v58 = vrot.slane %v84_v3, 1  ;;  %v418_v37 = vrot.slane %v417_v7, 1  ;;  %v98_v17 = vadd.f32 %v97_v11, %v96_v62  ;;  %v425_v18 = vrot.slane %v424_v9, 1 }
  0x39   :  { %v427_v16 = vmul.f32 0.125, %v405_v44  ;;  %v412_v40 = vadd.f32 %v411_v10, %v410_v6  ;;  %v101_v20 = vmul.f32 0.125, %v79_v12  ;;  %v92_v26 = vrot.slane %v91_v13, 1 }
  0x3a   :  { %v419_v21 = vadd.f32 %v418_v37, %v417_v7  ;;  %v99_v28 = vrot.slane %v98_v17, 1  ;;  %v996_v12 = vsub.s32 1, %v949_v29  ;;  %vm268_vm5 = vcmask 60416  }
  0x3b   :  { %190 = vadd.xlane.f32.xlu0 %v189_v19  ;;  %v86_v19 = vadd.f32 %v85_v58, %v84_v3  ;;  %v428_v23 = vmul.f32 0.125, %v412_v40  ;;  %v93_v31 = vadd.f32 %v92_v26, %v91_v13  ;;  %v168_v33 = vmul.f32 %v101_v20, %v874_v54 }
  0x3c   :  { %v429_v25 = vmul.f32 0.125, %v419_v21  ;;  %v100_v36 = vadd.f32 %v99_v28, %v98_v17  ;;  %v127_v49 = vmul.f32 %v101_v20, %v101_v20  ;;  %v1001_v40 = vsub.s32 0, %v949_v29 }
  0x3d   :  { %v450_v0 = vmul.f32 %v428_v23, %v428_v23  ;;  %v102_v32 = vmul.f32 0.125, %v86_v19  ;;  %v103_v39 = vmul.f32 0.125, %v93_v31  ;;  %v491_v59 = vmul.f32 %v428_v23, %v906_v46 }
  0x3e   :  { %v451_v2 = vmul.f32 %v429_v25, %v429_v25  ;;  %v104_v43 = vmul.f32 0.125, %v100_v36  ;;  %vm353_vm6 = vcmask 3072  }
  0x3f   :  { %512 = vadd.xlane.f32.xlu0 %v511_v22  ;;  %v426_v22 = vadd.f32 %v425_v18, %v424_v9  ;;  %v169_v41 = vmul.f32 %v102_v32, %v877_v57  ;;  %v170_v47 = vmul.f32 %v103_v39, %v879_v61  ;;  %v128_v4 = vmul.f32 %v102_v32, %v102_v32 }
  0x40   :  { %v171_v54 = vmul.f32 %v104_v43, %v889_v15  ;;  %v129_v50 = vmul.f32 %v103_v39, %v103_v39  ;;  %v130_v51 = vmul.f32 %v104_v43, %v104_v43  ;;  %v490_v61 = vmul.f32 %v427_v16, %v904_v45 }
  0x41   :  { %v176_v48 = vsel %vm113_vm1, %v169_v41, %v168_v33  ;;  %v135_v57 = vsel %vm113_vm1, %v128_v4, %v127_v49  ;;  %v492_v15 = vmul.f32 %v429_v25, %v915_v56 }
  0x42   :  { %v177_v8 = vsel %vm115_vm2, %v170_v47, %v176_v48  ;;  %v136_v53 = vsel %vm115_vm2, %v129_v50, %v135_v57  ;;  %v498_v6 = vsel %vm113_vm1, %v491_v59, %v490_v61  ;;  %v1032_v61 = vsub.s32 3, %v949_v29 }
  0x43   :  { %196 = vadd.xlane.f32.xlu0 %v195_v24  ;;  %v449_v24 = vmul.f32 %v427_v16, %v427_v16  ;;  %v979_v52 = vsel %vm117_vm3, %v171_v54, %v177_v8  ;;  %v984_v55 = vsel %vm117_vm3, %v130_v51, %v136_v53  ;;  %v499_v62 = vsel %vm115_vm2, %v492_v15, %v498_v6 }
  0x45   :  { %v457_v35 = vsel %vm113_vm1, %v450_v0, %v449_v24 }
  0x46   :  { %v458_v38 = vsel %vm115_vm2, %v451_v2, %v457_v35 }
  0x47   :  { %199 = vadd.xlane.f32.xlu0 %v198_v27  ;;  %v430_v27 = vmul.f32 0.125, %v426_v22 }
  0x49   :  { %v452_v34 = vmul.f32 %v430_v27, %v430_v27  ;;  %v493_v1 = vmul.f32 %v430_v27, %v921_v60 }
  0x4b   :  { %v972_v42 = vsel %vm117_vm3, %v452_v34, %v458_v38  ;;  %v993_v63 = vsel %vm117_vm3, %v493_v1, %v499_v62  ;;  %v1020_v38 = vsub.s32 2, %v949_v29 }
  0x9b   :  { %v150_v14 = vpop.xlane.xlu1 %149 }
  0x9c   :  { %v472_v3 = vpop.xlane.xlu0 %471  ;;  %v160_v56 = vmax.f32 %v150_v14, 1e-24 }
  0x9d   :  { %v482_v16 = vmax.f32 %v472_v3, 1e-24 }
  0x9f   :  { %v153_v5 = vpop.xlane.xlu1 %152 }
  0xa0   :  { %v161_v45 = vmax.f32 %v153_v5, 1e-24 }
  0xa3   :  { %v475_v10 = vpop.xlane.xlu1 %474 }
  0xa4   :  { %v483_v21 = vmax.f32 %v475_v10, 1e-24 }
  0xa7   :  { %v478_v46 = vpop.xlane.xlu1 %477 }
  0xa8   :  { %v484_v28 = vmax.f32 %v478_v46, 1e-24 }
  0xac   :  { %v481_v9 = vpop.xlane.xlu1 %480 }
  0xad   :  { %v485_v47 = vmax.f32 %v481_v9, 1e-24  ;;  %v139_v9 = vsel %vm120_vm4, %v984_v55, 0.0 }
  0xaf   :  { %v123_v7 = vpop.xlane.xlu0 %122 }
  0xb0   :  { %v124_v44 = vmax.f32 %v123_v7, 1e-24  ;;  %v194_v18 = vpop.xlane.xlu1 %193 }
  0xb2   :  { %714 = vrsqrt.f32 %v124_v44 }
  0xb3   :  { %716 = vrsqrt.f32 %v161_v45 }
  0xb4   :  { %718 = vrsqrt.f32 %v160_v56  ;;  %v516_v43 = vpop.xlane.xlu1 %515 }
  0xb8   :  { %v445_v11 = vpop.xlane.xlu0 %444  ;;  %v519_v59 = vpop.xlane.xlu1 %518 }
  0xb9   :  { %v446_v60 = vmax.f32 %v445_v11, 1e-24  ;;  %v461_v11 = vsel %vm120_vm4, %v972_v42, 0.0 }
  0xbb   :  { %720 = vrsqrt.f32 %v446_v60  ;;  %v180_v60 = vsel %vm120_vm4, %v979_v52, 0.0 }
  0xbc   :  { %v156_v37 = vpop.xlane.xlu0 %155  ;;  %722 = vrsqrt.f32 %v482_v16  ;;  %v522_v44 = vpop.xlane.xlu1 %521 }
  0xbd   :  { %v162_v24 = vmax.f32 %v156_v37, 1e-24  ;;  %724 = vrsqrt.f32 %v483_v21 }
  0xbf   :  { %v715_v58 = vpop.eup %714  ;;  %726 = vrsqrt.f32 %v162_v24 }
  0xc0   :  { %v998_v13 = vmul.f32 14.285714, %v715_v58  ;;  %v159_v19 = vpop.xlane.xlu0 %158  ;;  %v717_v26 = vpop.eup %716  ;;  %728 = vrsqrt.f32 %v484_v28  ;;  %v502_v58 = vsel %vm120_vm4, %v993_v63, 0.0 }
  0xc1   :  { %v719_v0 = vpop.eup %718  ;;  %v163_v34 = vmax.f32 %v159_v19, 1e-24 }
  0xc2   :  { %v209_v17 = vrot.slane %v998_v13, %v996_v12  ;;  %v205_v22 = vrot.slane %v998_v13, %v1001_v40  ;;  %v213_v4 = vrot.slane %v998_v13, %v1020_v38  ;;  %v217_v14 = vrot.slane %v998_v13, %v1032_v61 }
  0xc3   :  { %730 = vrsqrt.f32 %v163_v34 }
  0xc4   :  { %v223_v20 = vmul.f32 %v209_v17, %v194_v18  ;;  %v191_v25 = vpop.xlane.xlu0 %190  ;;  %732 = vrsqrt.f32 %v485_v47 }
  0xc5   :  { %v222_v27 = vmul.f32 %v205_v22, %v191_v25 }
  0xc6   :  { %v1007_v23 = vmul.f32 %v717_v26, %v223_v20 }
  0xc7   :  { %v1010_v2 = vmul.f32 %v719_v0, %v222_v27 }
  0xc8   :  { %238 = vperm.xlu1 %713, %v1007_v23   ;;  %v721_v31 = vpop.eup %720  ;;  %v513_v33 = vpop.xlane.xlu0 %512 }
  0xc9   :  { %v1012_v32 = vmul.f32 14.285714, %v721_v31  ;;  %235 = vperm.xlu0 %712, %v1010_v2   ;;  %v723_v41 = vpop.eup %722 }
  0xca   :  { %v725_v50 = vpop.eup %724 }
  0xcb   :  { %v531_v35 = vrot.slane %v1012_v32, %v996_v12  ;;  %v527_v36 = vrot.slane %v1012_v32, %v1001_v40  ;;  %v535_v8 = vrot.slane %v1012_v32, %v1020_v38  ;;  %v539_v5 = vrot.slane %v1012_v32, %v1032_v61 }
  0xcc   :  { %v197_v54 = vpop.xlane.xlu0 %196  ;;  %v727_v53 = vpop.eup %726 }
  0xcd   :  { %v544_v39 = vmul.f32 %v527_v36, %v513_v33  ;;  %v545_v48 = vmul.f32 %v531_v35, %v516_v43  ;;  %v224_v57 = vmul.f32 %v213_v4, %v197_v54  ;;  %v546_v15 = vmul.f32 %v535_v8, %v519_v59  ;;  %v729_v6 = vpop.eup %728 }
  0xce   :  { %v547_v10 = vmul.f32 %v539_v5, %v522_v44 }
  0xcf   :  { %v1022_v49 = vmul.f32 %v723_v41, %v544_v39  ;;  %v1027_v51 = vmul.f32 %v725_v50, %v545_v48  ;;  %v1035_v1 = vmul.f32 %v727_v53, %v224_v57  ;;  %v1040_v3 = vmul.f32 %v729_v6, %v546_v15 }
  0xd0   :  { %v200_v62 = vpop.xlane.xlu0 %199  ;;  %v731_v7 = vpop.eup %730 }
  0xd1   :  { %557 = vperm.xlu1 %713, %v1022_v49   ;;  %v225_v29 = vmul.f32 %v217_v14, %v200_v62  ;;  %v733_v46 = vpop.eup %732 }
  0xd2   :  { %v1048_v56 = vmul.f32 %v733_v46, %v547_v10 }
  0xd3   :  { %v1045_v45 = vmul.f32 %v731_v7, %v225_v29 }
  0xd5   :  { %560 = vperm.xlu1 %713, %v1027_v51  }
  0xd9   :  { %241 = vperm.xlu1 %713, %v1035_v1  }
  0xdd   :  { %563 = vperm.xlu1 %713, %v1040_v3  }
  0xe1   :  { %244 = vperm.xlu1 %713, %v1045_v45  }
  0xe5   :  { %566 = vperm.xlu1 %713, %v1048_v56  }
  0xe8   :  { %462 = vadd.xlane.f32.xlu0 %v461_v11 }
  0xec   :  { %181 = vadd.xlane.f32.xlu0 %v180_v60 }
 0x109   :  { %140 = vadd.xlane.f32.xlu1 %v139_v9 }
 0x10d   :  { %503 = vadd.xlane.f32.xlu1 %v502_v58 }
 0x143   :  { %v239_v37 = vpop.permute.xlu1 %238 }
 0x144   :  { %v236_v20 = vpop.permute.xlu0 %235  ;;  %v255_v42 = vrot.slane %v239_v37, %v952_v30 }
 0x145   :  { %v251_v26 = vrot.slane %v236_v20, %v952_v30 }
 0x147   :  { %v264_v55 = vsel %vm113_vm1, %v255_v42, %v251_v26 }
 0x14c   :  { %v558_v16 = vpop.permute.xlu1 %557 }
 0x14d   :  { %v571_v27 = vrot.slane %v558_v16, %v952_v30 }
 0x150   :  { %v561_v17 = vpop.permute.xlu1 %560 }
 0x151   :  { %v575_v22 = vrot.slane %v561_v17, %v952_v30 }
 0x153   :  { %v584_v33 = vsel %vm113_vm1, %v575_v22, %v571_v27 }
 0x154   :  { %v242_v18 = vpop.permute.xlu1 %241 }
 0x155   :  { %v259_v52 = vrot.slane %v242_v18, %v952_v30 }
 0x157   :  { %v265_v25 = vsel %vm115_vm2, %v259_v52, %v264_v55 }
 0x158   :  { %v564_v19 = vpop.permute.xlu1 %563 }
 0x159   :  { %v579_v24 = vrot.slane %v564_v19, %v952_v30 }
 0x15b   :  { %v585_v35 = vsel %vm115_vm2, %v579_v24, %v584_v33 }
 0x15c   :  { %v245_v21 = vpop.permute.xlu1 %244 }
 0x15d   :  { %v263_v63 = vrot.slane %v245_v21, %v952_v30 }
 0x15f   :  { %v266_v0 = vsel %vm117_vm3, %v263_v63, %v265_v25 }
 0x160   :  { %v567_v28 = vpop.permute.xlu1 %566  ;;  %v269_v31 = vsel %vm268_vm5, %v266_v0, -inf }
 0x161   :  { %v583_v34 = vrot.slane %v567_v28, %v952_v30  ;;  %270 = vmax.xlane.f32.xlu0 %v269_v31 }
 0x163   :  { %v586_v36 = vsel %vm117_vm3, %v583_v34, %v585_v35 }
 0x164   :  { %v588_v39 = vsel %vm268_vm5, %v586_v36, -inf }
 0x165   :  { %589 = vmax.xlane.f32.xlu1 %v588_v39 }
 0x171   :  { %v463_v47 = vpop.xlane.xlu0 %462 }
 0x172   :  { %v464_v48 = vmax.f32 %v463_v47, 1e-24 }
 0x175   :  { %v182_v54 = vpop.xlane.xlu0 %181 }
 0x176   :  { %v183_v50 = vmul.f32 %v182_v54, %v998_v13 }
 0x192   :  { %v141_v41 = vpop.xlane.xlu1 %140 }
 0x193   :  { %v142_v43 = vmax.f32 %v141_v41, 1e-24 }
 0x195   :  { %734 = vrsqrt.f32 %v142_v43 }
 0x196   :  { %736 = vrsqrt.f32 %v464_v48  ;;  %v504_v8 = vpop.xlane.xlu1 %503 }
 0x197   :  { %v505_v53 = vmul.f32 %v504_v8, %v1012_v32 }
 0x1a2   :  { %v735_v4 = vpop.eup %734 }
 0x1a3   :  { %v1076_v57 = vmul.f32 %v735_v4, %v183_v50  ;;  %v737_v15 = vpop.eup %736 }
 0x1a4   :  { %v1086_v5 = vmul.f32 %v737_v15, %v505_v53 }
 0x1ea   :  { %v271_v59 = vpop.xlane.xlu0 %270 }
 0x1eb   :  { %v1080_v6 = vmax.f32 %v1076_v57, %v271_v59 }
 0x1ed   :  { %v280_v62 = vrot.slane %v1080_v6, %v1001_v40  ;;  %v284_v14 = vrot.slane %v1080_v6, %v996_v12  ;;  %v288_v32 = vrot.slane %v1080_v6, %v1020_v38  ;;  %v273_v59 = vsub.f32 %v1076_v57, %v1080_v6 }
 0x1ee   :  { %v590_v29 = vpop.xlane.xlu1 %589 }
 0x1ef   :  { %v297_v13 = vsub.f32 %v1010_v2, %v280_v62  ;;  %v298_v7 = vsub.f32 %v1007_v23, %v284_v14  ;;  %v1093_v44 = vmax.f32 %v1086_v5, %v590_v29  ;;  %v292_v23 = vrot.slane %v1080_v6, %v1032_v61 }
 0x1f0   :  { %v299_v2 = vsub.f32 %v1035_v1, %v288_v32  ;;  %v274_v15 = vmul.f32 1.442695, %v273_v59 }
 0x1f1   :  { %v301_v10 = vmul.f32 1.442695, %v297_v13  ;;  %v303_v46 = vmul.f32 1.442695, %v298_v7  ;;  %v599_v11 = vrot.slane %v1093_v44, %v1001_v40  ;;  %v603_v60 = vrot.slane %v1093_v44, %v996_v12 }
 0x1f2   :  { %v607_v9 = vrot.slane %v1093_v44, %v1020_v38  ;;  %v611_v40 = vrot.slane %v1093_v44, %v1032_v61  ;;  %v300_v38 = vsub.f32 %v1045_v45, %v292_v23  ;;  %v305_v18 = vmul.f32 1.442695, %v299_v2 }
 0x1f3   :  { %738 = vpow2.f32 %v301_v10  ;;  %v616_v58 = vsub.f32 %v1022_v49, %v599_v11  ;;  %v617_v37 = vsub.f32 %v1027_v51, %v603_v60 }
 0x1f4   :  { %740 = vpow2.f32 %v303_v46  ;;  %v618_v16 = vsub.f32 %v1040_v3, %v607_v9  ;;  %v619_v20 = vsub.f32 %v1048_v56, %v611_v40  ;;  %v307_v19 = vmul.f32 1.442695, %v300_v38 }
 0x1f5   :  { %v620_v12 = vmul.f32 1.442695, %v616_v58  ;;  %v622_v17 = vmul.f32 1.442695, %v617_v37 }
 0x1f6   :  { %v624_v1 = vmul.f32 1.442695, %v618_v16  ;;  %v626_v49 = vmul.f32 1.442695, %v619_v20 }
 0x1f7   :  { %742 = vpow2.f32 %v620_v12 }
 0x1f8   :  { %744 = vpow2.f32 %v622_v17 }
 0x1f9   :  { %746 = vpow2.f32 %v305_v18 }
 0x1fa   :  { %748 = vpow2.f32 %v624_v1 }
 0x1fb   :  { %750 = vpow2.f32 %v307_v19 }
 0x1fc   :  { %752 = vpow2.f32 %v626_v49 }
 0x1fd   :  { %754 = vpow2.f32 %v274_v15 }
 0x200   :  { %v739_v51 = vpop.eup %738 }
 0x201   :  { %v741_v42 = vpop.eup %740  ;;  %314 = vperm.xlu0 %712, %v739_v51  }
 0x202   :  { %317 = vperm.xlu1 %713, %v741_v42  }
 0x204   :  { %v743_v61 = vpop.eup %742 }
 0x205   :  { %v745_v3 = vpop.eup %744 }
 0x206   :  { %633 = vperm.xlu1 %713, %v743_v61   ;;  %636 = vperm.xlu0 %712, %v745_v3   ;;  %v747_v45 = vpop.eup %746 }
 0x207   :  { %v749_v26 = vpop.eup %748 }
 0x208   :  { %v751_v56 = vpop.eup %750 }
 0x209   :  { %v753_v52 = vpop.eup %752 }
 0x20a   :  { %320 = vperm.xlu1 %713, %v747_v45   ;;  %639 = vperm.xlu0 %712, %v749_v26   ;;  %v755_v14 = vpop.eup %754 }
 0x20e   :  { %323 = vperm.xlu1 %713, %v751_v56   ;;  %642 = vperm.xlu0 %712, %v753_v52  }
 0x27c   :  { %v315_v21 = vpop.permute.xlu0 %314 }
 0x27d   :  { %v318_v55 = vpop.permute.xlu1 %317  ;;  %v328_v27 = vrot.slane %v315_v21, %v952_v30 }
 0x27e   :  { %v332_v25 = vrot.slane %v318_v55, %v952_v30 }
 0x280   :  { %v341_v36 = vsel %vm113_vm1, %v332_v25, %v328_v27 }
 0x281   :  { %v634_v22 = vpop.permute.xlu1 %633  ;;  %v637_v63 = vpop.permute.xlu0 %636 }
 0x282   :  { %v647_v28 = vrot.slane %v634_v22, %v952_v30  ;;  %v651_v31 = vrot.slane %v637_v63, %v952_v30 }
 0x284   :  { %v660_v43 = vsel %vm113_vm1, %v651_v31, %v647_v28 }
 0x285   :  { %v321_v24 = vpop.permute.xlu1 %320  ;;  %v640_v0 = vpop.permute.xlu0 %639 }
 0x286   :  { %v336_v33 = vrot.slane %v321_v24, %v952_v30  ;;  %v655_v34 = vrot.slane %v640_v0, %v952_v30 }
 0x288   :  { %v342_v48 = vsel %vm115_vm2, %v336_v33, %v341_v36  ;;  %v661_v4 = vsel %vm115_vm2, %v655_v34, %v660_v43 }
 0x289   :  { %v324_v35 = vpop.permute.xlu1 %323  ;;  %v643_v41 = vpop.permute.xlu0 %642 }
 0x28a   :  { %v340_v39 = vrot.slane %v324_v35, %v952_v30  ;;  %v659_v47 = vrot.slane %v643_v41, %v952_v30  ;;  %v592_v30 = vsub.f32 %v1086_v5, %v1093_v44 }
 0x28c   :  { %v343_v54 = vsel %vm117_vm3, %v340_v39, %v342_v48  ;;  %v662_v8 = vsel %vm117_vm3, %v659_v47, %v661_v4  ;;  %v593_v62 = vmul.f32 1.442695, %v592_v30 }
 0x28d   :  { %v345_v50 = vsel %vm268_vm5, %v343_v54, 0.0  ;;  %v664_v53 = vsel %vm268_vm5, %v662_v8, 0.0 }
 0x28e   :  { %346 = vadd.xlane.f32.xlu1 %v345_v50  ;;  %665 = vadd.xlane.f32.xlu0 %v664_v53  ;;  %756 = vpow2.f32 %v593_v62 }
 0x29b   :  { %v757_v13 = vpop.eup %756 }
 0x317   :  { %v347_v29 = vpop.xlane.xlu1 %346  ;;  %v666_v32 = vpop.xlane.xlu0 %665 }
 0x318   :  { %v348_v7 = vadd.f32 %v755_v14, %v347_v29  ;;  %v667_v10 = vadd.f32 %v757_v13, %v666_v32 }
 0x31a   :  { %758 = vlog2.f32 %v348_v7 }
 0x31b   :  { %760 = vlog2.f32 %v667_v10 }
 0x327   :  { %v759_v46 = vpop.eup %758 }
 0x328   :  { %v761_v11 = vpop.eup %760  ;;  %v350_v60 = vmul.f32 0.6931472, %v759_v46 }
 0x329   :  { %v669_v9 = vmul.f32 0.6931472, %v761_v11 }
 0x32a   :  { %v351_v23 = vadd.f32 %v350_v60, %v1080_v6 }
 0x32b   :  { %v670_v2 = vadd.f32 %v669_v9, %v1093_v44 }
 0x32c   :  { %v352_v58 = vsub.f32 %v351_v23, %v1076_v57 }
 0x32d   :  { %v671_v37 = vsub.f32 %v670_v2, %v1086_v5 }
 0x32e   :  { %v354_v40 = vsel %vm353_vm6, %v352_v58, 0.0 }
 0x32f   :  { %v672_v16 = vsel %vm353_vm6, %v671_v37, 0.0  ;;  %355 = vadd.xlane.f32.xlu0 %v354_v40 }
 0x330   :  { %673 = vadd.xlane.f32.xlu1 %v672_v16 }
 0x3b8   :  { %v356_v12 = vpop.xlane.xlu0 %355 }
 0x3b9   :  { %v674_v17 = vpop.xlane.xlu1 %673  ;;  %v357_v38 = vrot.slane %v356_v12, 4 }
 0x3ba   :  { %v675_v18 = vrot.slane %v674_v17, 4 }
 0x3bb   :  { %v358_v20 = vadd.f32 %v357_v38, %v356_v12 }
 0x3bc   :  { %v676_v1 = vadd.f32 %v675_v18, %v674_v17 }
 0x3bd   :  { %v359_v19 = vrot.slane %v358_v20, 2 }
 0x3be   :  { %v677_v49 = vrot.slane %v676_v1, 2 }
 0x3bf   :  { %v360_v6 = vadd.f32 %v359_v19, %v358_v20 }
 0x3c0   :  { %v678_v51 = vadd.f32 %v677_v49, %v676_v1 }
 0x3c1   :  { %v361_v42 = vrot.slane %v360_v6, 1 }
 0x3c2   :  { %v679_v44 = vrot.slane %v678_v51, 1 }
 0x3c3   :  { %v362_v61 = vadd.f32 %v361_v42, %v360_v6 }
 0x3c4   :  { %v680_v57 = vadd.f32 %v679_v44, %v678_v51 }
 0x3c5   :  { %703 = vpush %v362_v61 }
 0x3c6   :  { %705 = vpush %v680_v57 }
 0x3f6   :  { %s704_s0 = spop %703 }
 0x3f7   :  { %s366_s13 = smul.f32 0.25, %s704_s0  ;;  %s706_s14 = spop %705 }
 0x3f8   :  { %s684_s15 = smul.f32 0.25, %s706_s14 }
 0x3fa   :  { %s685_s18 = sadd.f32 %s684_s15, %s366_s13 }
 0x3fc   :  { %v686_v5 = vstv %s685_s18 }
 0x3fd   :  { %687 = vst [vmem:[#allocation5] sm:$0x1] %v686_v5 }
 0x3fe   :  { %793 = shalt.err (!%p790_p9)
}
 0x3ff   :  { %697 = dma.vmem_to_hbm [thread:$0]  %s695_s17, 16, %s1139_s1, [#allocation4]  }
 0x400   :  { %804 = dma.done.wait [#allocation4], 16  }
 0x401   :  { %805 = vsyncadd [#allocation4], 4294967280 }
 0x402   :  { %701 = vsyncpa [#allocation3], 1 }
 0x403   :  { %702 = vsyncpa [#allocation4], 1 }

</bundles_post_ra>
